<compile_context>
chip_gen: v5e
topology: v5e:2x2
jax: 0.10.0
libtpu: 0.0.40
codegen_flags: <defaults>
</compile_context>

<pallas_src>
import math

import jax
import jax.numpy as jnp
from jax.experimental import pallas as pl
from jax.experimental.pallas import tpu as pltpu

LANE = 128


def _cmp_swap(a, b):
    return jnp.minimum(a, b), jnp.maximum(a, b)


def _median_pair(load_row, L):
    """Return the (L-1)//2-th and L//2-th order statistics (0-indexed) of the
    L rows produced by load_row(i), via a forgetful median-selection network."""
    if L == 1:
        r = load_row(0)
        return r, r
    if L == 2:
        return load_row(0), load_row(1)

    T = L // 2 + 2  # working buffer size (<= L for L >= 3)
    buf = [load_row(i) for i in range(T)]
    # Sort the initial buffer with an odd-even transposition network.
    for p in range(T):
        for i in range(p % 2, T - 1, 2):
            buf[i], buf[i + 1] = _cmp_swap(buf[i], buf[i + 1])
    # Forgetful selection: drop the current extremes, insert the next row
    # (sorted insertion via a compare-exchange chain), repeat.
    nxt = T
    while True:
        buf = buf[1:-1]  # forget current min and max
        if nxt >= L:
            break
        carry = load_row(nxt)
        nxt += 1
        new_buf = []
        for b in buf:
            lo, carry = _cmp_swap(b, carry)
            new_buf.append(lo)
        new_buf.append(carry)
        buf = new_buf
    # Final buffer: the two middle order statistics (even L) or the median (odd L).
    if len(buf) == 2:
        return buf[0], buf[1]
    return buf[0], buf[0]


def _make_kernel(L, Rt, sub, sub_tile):
    n_chunks = Rt // sub

    def kernel(x_ref, o_ref):
        # x_ref: (L, Rt, LANE) in the compare dtype ; o_ref: (Rt, LANE) float32
        def do_chunk(off):
            def load_row(i):
                return x_ref[i, pl.ds(off, sub), :]

            a, b = _median_pair(load_row, L)
            med = (a.astype(jnp.float32) + b.astype(jnp.float32)) * 0.5
            o_ref[pl.ds(off, sub), :] = med

        if n_chunks == 1:
            do_chunk(0)
        else:
            @pl.loop(0, n_chunks)
            def _(c):
                do_chunk(pl.multiple_of(c * sub, sub_tile))

    return kernel


def median_pool_1d(x, pooling_axis=-2, *, target_block_bytes=1 << 20, vreg_budget=40):
    """JAX/Pallas equivalent of MedianPool1d(pooling_axis).forward(x)."""
    x = jnp.asarray(x)
    axis = pooling_axis % x.ndim
    L = x.shape[axis]

    # Move the pooling axis to the front; flatten everything else.
    x_m = jnp.moveaxis(x, axis, 0)
    rest_shape = x_m.shape[1:]
    M = int(math.prod(rest_shape)) if rest_shape else 1
    if M == 0:
        return jnp.zeros(rest_shape, jnp.float32)

    # Compare in the native dtype when it embeds exactly in f32 (same ordering
    # as torch's cast-to-f32-then-sort); otherwise cast to f32 up front.
    if x.dtype in (jnp.bfloat16, jnp.float16, jnp.float32):
        sort_dtype = x.dtype
    else:
        sort_dtype = jnp.float32
    itemsize = jnp.dtype(sort_dtype).itemsize
    sub_tile = 8 * (4 // itemsize)  # (8,128) for f32, (16,128) for bf16/f16

    x2 = x_m.reshape(L, M).astype(sort_dtype)

    # Lane-dense layout: pad flattened non-pooled dim and view as (L, R, 128).
    R_raw = -(-M // LANE)
    R_min = -(-R_raw // sub_tile) * sub_tile

    # Per-chunk sublane extent: keep (live rows) x (vregs per row) within the
    # vreg budget; round down to a power of two, clamp to what exists.
    live_rows = min(L, L // 2 + 2) + 2
    sub_budget = max((vreg_budget * 4096) // (live_rows * LANE * itemsize), 1)
    sub = 1 << (sub_budget.bit_length() - 1)
    sub = max(sub, sub_tile)
    sub = min(sub, R_min)

    # Chunks per block: make each pipelined DMA block a decent size.
    chunk_bytes = L * sub * LANE * itemsize
    max_chunks_fit = max(1, target_block_bytes // chunk_bytes)
    n_chunks = max(1, min(-(-R_min // sub), max_chunks_fit))
    Rt = sub * n_chunks
    R = -(-R_raw // Rt) * Rt  # pad so the grid tiles exactly
    grid_r = R // Rt

    M_pad = R * LANE
    if M_pad > M:
        x2 = jnp.pad(x2, ((0, 0), (0, M_pad - M)))
    x3 = x2.reshape(L, R, LANE)

    in_block_bytes = L * Rt * LANE * itemsize
    out_block_bytes = Rt * LANE * 4
    vmem_limit = 2 * (in_block_bytes + out_block_bytes) + (4 << 20)
    vmem_limit = int(min(max(vmem_limit, 16 << 20), 48 << 20))

    kernel = _make_kernel(L, Rt, sub, sub_tile)
    out = pl.pallas_call(
        kernel,
        out_shape=jax.ShapeDtypeStruct((R, LANE), jnp.float32),
        grid=(grid_r,),
        in_specs=[pl.BlockSpec((L, Rt, LANE), lambda r: (0, r, 0))],
        out_specs=pl.BlockSpec((Rt, LANE), lambda r: (r, 0)),
        compiler_params=pltpu.CompilerParams(
            dimension_semantics=("parallel",),
            vmem_limit_bytes=vmem_limit,
        ),
    )(x3)

    return out.reshape(R * LANE)[:M].reshape(rest_shape)


if __name__ == "__main__":
    key = jax.random.PRNGKey(0)
    k1, k2, k3, k4 = jax.random.split(key, 4)

    # 1) Module-default small case: batch=2, channels=4, seq=8, hidden=32;
    #    median over the seq axis (pooling_axis=-2) -> output (2, 4, 32).
    x1 = jax.random.normal(k1, (2, 4, 8, 32), dtype=jnp.float32)
    y1 = jax.block_until_ready(median_pool_1d(x1, pooling_axis=-2))
    r1 = jnp.quantile(x1.astype(jnp.float32), 0.5, axis=-2)
    assert y1.shape == r1.shape and y1.dtype == jnp.float32, (y1.shape, y1.dtype)
    assert jnp.allclose(y1, r1, atol=1e-6, rtol=1e-6), "f32 even-L mismatch"

    # 2) Odd pooling length.
    x2 = jax.random.normal(k2, (3, 7, 16), dtype=jnp.float32)
    y2 = jax.block_until_ready(median_pool_1d(x2, pooling_axis=-2))
    r2 = jnp.quantile(x2, 0.5, axis=-2)
    assert jnp.allclose(y2, r2, atol=1e-6, rtol=1e-6), "f32 odd-L mismatch"

    # 3) Force the multi-chunk / multi-grid-step path with a still-small input.
    x3 = jax.random.normal(k3, (2, 4, 8, 512), dtype=jnp.float32)
    y3 = jax.block_until_ready(
        median_pool_1d(x3, pooling_axis=-2, target_block_bytes=1 << 16, vreg_budget=8)
    )
    r3 = jnp.quantile(x3, 0.5, axis=-2)
    assert jnp.allclose(y3, r3, atol=1e-6, rtol=1e-6), "tiled-path mismatch"

    # 4) bf16 input: compared in bf16, averaged in f32 (matches cast-to-f32 ref).
    x4 = jax.random.normal(k4, (2, 4, 8, 32), dtype=jnp.bfloat16)
    y4 = jax.block_until_ready(median_pool_1d(x4, pooling_axis=-2))
    r4 = jnp.quantile(x4.astype(jnp.float32), 0.5, axis=-2)
    assert jnp.allclose(y4, r4, atol=1e-5, rtol=1e-5), "bf16 mismatch"

    print("KERNEL_OK")
</pallas_src>

<mosaic_0001>
module attributes {stable_mosaic.version = 11 : i64} {
  func.func @kernel(%arg0: i32, %arg1: memref<8x8x128xf32, #tpu.memory_space<vmem>>, %arg2: memref<8x128xf32, #tpu.memory_space<vmem>>) attributes {dimension_semantics = [#tpu.dimension_semantics<parallel>], iteration_bounds = array<i64: 1>, scalar_prefetch = 0 : i64, scratch_operands = 0 : i64, tpu.core_type = #tpu.core_type<tc>, window_params = [{transform_indices = @transform_0, window_bounds = array<i64: 8, 8, 128>}, {transform_indices = @transform_1, window_bounds = array<i64: 8, 128>}]} {
    %c0 = arith.constant 0 : index
    %c0_0 = arith.constant 0 : index
    %c0_1 = arith.constant 0 : index
    %0 = vector.load %arg1[%c0, %c0_0, %c0_1] : memref<8x8x128xf32, #tpu.memory_space<vmem>>, vector<1x8x128xf32>
    %1 = vector.shape_cast %0 : vector<1x8x128xf32> to vector<8x128xf32>
    %c1 = arith.constant 1 : index
    %c0_2 = arith.constant 0 : index
    %c0_3 = arith.constant 0 : index
    %2 = vector.load %arg1[%c1, %c0_2, %c0_3] : memref<8x8x128xf32, #tpu.memory_space<vmem>>, vector<1x8x128xf32>
    %3 = vector.shape_cast %2 : vector<1x8x128xf32> to vector<8x128xf32>
    %c2 = arith.constant 2 : index
    %c0_4 = arith.constant 0 : index
    %c0_5 = arith.constant 0 : index
    %4 = vector.load %arg1[%c2, %c0_4, %c0_5] : memref<8x8x128xf32, #tpu.memory_space<vmem>>, vector<1x8x128xf32>
    %5 = vector.shape_cast %4 : vector<1x8x128xf32> to vector<8x128xf32>
    %c3 = arith.constant 3 : index
    %c0_6 = arith.constant 0 : index
    %c0_7 = arith.constant 0 : index
    %6 = vector.load %arg1[%c3, %c0_6, %c0_7] : memref<8x8x128xf32, #tpu.memory_space<vmem>>, vector<1x8x128xf32>
    %7 = vector.shape_cast %6 : vector<1x8x128xf32> to vector<8x128xf32>
    %c4 = arith.constant 4 : index
    %c0_8 = arith.constant 0 : index
    %c0_9 = arith.constant 0 : index
    %8 = vector.load %arg1[%c4, %c0_8, %c0_9] : memref<8x8x128xf32, #tpu.memory_space<vmem>>, vector<1x8x128xf32>
    %9 = vector.shape_cast %8 : vector<1x8x128xf32> to vector<8x128xf32>
    %c5 = arith.constant 5 : index
    %c0_10 = arith.constant 0 : index
    %c0_11 = arith.constant 0 : index
    %10 = vector.load %arg1[%c5, %c0_10, %c0_11] : memref<8x8x128xf32, #tpu.memory_space<vmem>>, vector<1x8x128xf32>
    %11 = vector.shape_cast %10 : vector<1x8x128xf32> to vector<8x128xf32>
    %12 = arith.minimumf %1, %3 : vector<8x128xf32>
    %13 = arith.maximumf %1, %3 : vector<8x128xf32>
    %14 = arith.minimumf %5, %7 : vector<8x128xf32>
    %15 = arith.maximumf %5, %7 : vector<8x128xf32>
    %16 = arith.minimumf %9, %11 : vector<8x128xf32>
    %17 = arith.maximumf %9, %11 : vector<8x128xf32>
    %18 = arith.minimumf %13, %14 : vector<8x128xf32>
    %19 = arith.maximumf %13, %14 : vector<8x128xf32>
    %20 = arith.minimumf %15, %16 : vector<8x128xf32>
    %21 = arith.maximumf %15, %16 : vector<8x128xf32>
    %22 = arith.minimumf %12, %18 : vector<8x128xf32>
    %23 = arith.maximumf %12, %18 : vector<8x128xf32>
    %24 = arith.minimumf %19, %20 : vector<8x128xf32>
    %25 = arith.maximumf %19, %20 : vector<8x128xf32>
    %26 = arith.minimumf %21, %17 : vector<8x128xf32>
    %27 = arith.maximumf %21, %17 : vector<8x128xf32>
    %28 = arith.minimumf %23, %24 : vector<8x128xf32>
    %29 = arith.maximumf %23, %24 : vector<8x128xf32>
    %30 = arith.minimumf %25, %26 : vector<8x128xf32>
    %31 = arith.maximumf %25, %26 : vector<8x128xf32>
    %32 = arith.maximumf %22, %28 : vector<8x128xf32>
    %33 = arith.minimumf %29, %30 : vector<8x128xf32>
    %34 = arith.maximumf %29, %30 : vector<8x128xf32>
    %35 = arith.minimumf %31, %27 : vector<8x128xf32>
    %36 = arith.minimumf %32, %33 : vector<8x128xf32>
    %37 = arith.maximumf %32, %33 : vector<8x128xf32>
    %38 = arith.minimumf %34, %35 : vector<8x128xf32>
    %39 = arith.maximumf %34, %35 : vector<8x128xf32>
    %c6 = arith.constant 6 : index
    %c0_12 = arith.constant 0 : index
    %c0_13 = arith.constant 0 : index
    %40 = vector.load %arg1[%c6, %c0_12, %c0_13] : memref<8x8x128xf32, #tpu.memory_space<vmem>>, vector<1x8x128xf32>
    %41 = vector.shape_cast %40 : vector<1x8x128xf32> to vector<8x128xf32>
    %42 = arith.maximumf %36, %41 : vector<8x128xf32>
    %43 = arith.minimumf %37, %42 : vector<8x128xf32>
    %44 = arith.maximumf %37, %42 : vector<8x128xf32>
    %45 = arith.minimumf %38, %44 : vector<8x128xf32>
    %46 = arith.maximumf %38, %44 : vector<8x128xf32>
    %47 = arith.minimumf %39, %46 : vector<8x128xf32>
    %c7 = arith.constant 7 : index
    %c0_14 = arith.constant 0 : index
    %c0_15 = arith.constant 0 : index
    %48 = vector.load %arg1[%c7, %c0_14, %c0_15] : memref<8x8x128xf32, #tpu.memory_space<vmem>>, vector<1x8x128xf32>
    %49 = vector.shape_cast %48 : vector<1x8x128xf32> to vector<8x128xf32>
    %50 = arith.maximumf %43, %49 : vector<8x128xf32>
    %51 = arith.minimumf %45, %50 : vector<8x128xf32>
    %52 = arith.maximumf %45, %50 : vector<8x128xf32>
    %53 = arith.minimumf %47, %52 : vector<8x128xf32>
    %54 = arith.addf %51, %53 : vector<8x128xf32>
    %cst = arith.constant 5.000000e-01 : f32
    %55 = vector.broadcast %cst : f32 to vector<8x128xf32>
    %56 = arith.mulf %54, %55 : vector<8x128xf32>
    %c0_16 = arith.constant 0 : index
    %c0_17 = arith.constant 0 : index
    %57 = vector.load %arg2[%c0_16, %c0_17] : memref<8x128xf32, #tpu.memory_space<vmem>>, vector<8x128xf32>
    tpu.vector_store %arg2[%c0_16, %c0_17], %56 {strides = array<i32>} : memref<8x128xf32, #tpu.memory_space<vmem>>, vector<8x128xf32>,
    return
  }
  func.func @transform_0(%arg0: i32) -> (i32, i32, i32) {
    %c0_i32 = arith.constant 0 : i32
    %c0_i32_0 = arith.constant 0 : i32
    %c0_i32_1 = arith.constant 0 : i32
    return %c0_i32, %arg0, %c0_i32_0 : i32, i32, i32
  }
  func.func @transform_1(%arg0: i32) -> (i32, i32) {
    %c0_i32 = arith.constant 0 : i32
    %c0_i32_0 = arith.constant 0 : i32
    return %arg0, %c0_i32 : i32, i32
  }
}

</mosaic_0001>

<bundles_post_ra>
// kernel: tpu_custom_call.1
= control target key start
LH: loop header
LB: loop body
LE: loop exit
PB: predicated region body
PF: predicated region fallthrough
CT: control target
= control target key end

     0   :  { %6 = vsyncpa [#allocation3], 0  ;;  %s174_s0 = inlined_call_operand.hbm [shape: f32[8,8,128], index: 0, kind: input, shape index: {}]   ;;  %s175_s1 = inlined_call_operand.hbm [shape: f32[8,128], index: 1, kind: output, shape index: {}]  }
   0x1   :  { %7 = vsyncpa [#allocation4], 0  ;;  %s12_s8 = sshll.u32 %s174_s0, 4  ;;  %s154_s9 = smov [#allocation2]   ;;  %s13_s8 = int_to_ptr.hbm [resolvable:$true] %s12_s8 }
   0x2   :  { %s14_s10 = sshll.u32 %s154_s9, 4  ;;  %s155_s11 = smov 128   ;;  %s15_s10 = int_to_ptr.vmem [resolvable:$true] %s14_s10 }
   0x3   :  { %s156_s12 = smov 8  }
   0x4   :  { %20 = dma.hbm_to_vmem [thread:$0]  %s13_s8, 1024, %s15_s10, [#allocation3], %s155_s11, %s155_s11, %s156_s12  }
   0x5   :  { %150 = dma.done.wait [#allocation3], 1024  }
   0x6   :  { %151 = vsyncadd [#allocation3], 4294966272  ;;  %v25_v0 = vld [vmem:[#allocation2] sm:$0xff]  ;;  %v27_v1 = vld [vmem:[#allocation2 + $0x8] sm:$0xff]  ;;  %s157_s0 = smov [#allocation5]   ;;  %s88_s16 = sshll.u32 %s175_s1, 4  ;;  %s89_s16 = int_to_ptr.hbm [resolvable:$true] %s88_s16 }
   0x7   :  { %v29_v2 = vld [vmem:[#allocation2 + $0x10] sm:$0xff]  ;;  %v31_v3 = vld [vmem:[#allocation2 + $0x18] sm:$0xff]  ;;  %v33_v4 = vld [vmem:[#allocation2 + $0x20] sm:$0xff]  ;;  %v37_v6 = vmax.f32 %v25_v0, %v27_v1  ;;  %v36_v7 = vmin.f32 %v25_v0, %v27_v1  ;;  %s86_s13 = sshll.u32 %s157_s0, 4  ;;  %s87_s13 = int_to_ptr.vmem [resolvable:$true] %s86_s13 }
   0x8   :  { %v35_v5 = vld [vmem:[#allocation2 + $0x28] sm:$0xff]  ;;  %v38_v8 = vmin.f32 %v29_v2, %v31_v3  ;;  %v39_v9 = vmax.f32 %v29_v2, %v31_v3  ;;  %v65_v30 = vld [vmem:[#allocation2 + $0x30] sm:$0xff]  ;;  %v73_v35 = vld [vmem:[#allocation2 + $0x38] sm:$0xff] }
   0x9   :  { %v40_v10 = vmin.f32 %v33_v4, %v35_v5  ;;  %v41_v11 = vmax.f32 %v33_v4, %v35_v5 }
   0xa   :  { %v42_v12 = vmin.f32 %v37_v6, %v38_v8  ;;  %v43_v13 = vmax.f32 %v37_v6, %v38_v8 }
   0xb   :  { %v44_v14 = vmin.f32 %v39_v9, %v40_v10  ;;  %v45_v15 = vmax.f32 %v39_v9, %v40_v10 }
   0xc   :  { %v46_v16 = vmin.f32 %v36_v7, %v42_v12  ;;  %v47_v17 = vmax.f32 %v36_v7, %v42_v12 }
   0xd   :  { %v48_v18 = vmin.f32 %v43_v13, %v44_v14  ;;  %v49_v19 = vmax.f32 %v43_v13, %v44_v14  ;;  %v50_v20 = vmin.f32 %v45_v15, %v41_v11  ;;  %v51_v21 = vmax.f32 %v45_v15, %v41_v11 }
   0xf   :  { %v52_v22 = vmin.f32 %v47_v17, %v48_v18  ;;  %v53_v23 = vmax.f32 %v47_v17, %v48_v18  ;;  %v54_v24 = vmin.f32 %v49_v19, %v50_v20  ;;  %v55_v25 = vmax.f32 %v49_v19, %v50_v20 }
  0x11   :  { %v56_v26 = vmax.f32 %v46_v16, %v52_v22  ;;  %v57_v27 = vmin.f32 %v53_v23, %v54_v24  ;;  %v58_v28 = vmax.f32 %v53_v23, %v54_v24  ;;  %v59_v29 = vmin.f32 %v55_v25, %v51_v21 }
  0x13   :  { %v60_v31 = vmin.f32 %v56_v26, %v57_v27  ;;  %v61_v32 = vmax.f32 %v56_v26, %v57_v27  ;;  %v62_v33 = vmin.f32 %v58_v28, %v59_v29  ;;  %v63_v36 = vmax.f32 %v58_v28, %v59_v29 }
  0x15   :  { %v66_v34 = vmax.f32 %v60_v31, %v65_v30 }
  0x17   :  { %v67_v37 = vmin.f32 %v61_v32, %v66_v34  ;;  %v68_v38 = vmax.f32 %v61_v32, %v66_v34 }
  0x19   :  { %v69_v39 = vmin.f32 %v62_v33, %v68_v38  ;;  %v70_v40 = vmax.f32 %v62_v33, %v68_v38  ;;  %v74_v41 = vmax.f32 %v67_v37, %v73_v35 }
  0x1b   :  { %v71_v42 = vmin.f32 %v63_v36, %v70_v40  ;;  %v75_v43 = vmin.f32 %v69_v39, %v74_v41  ;;  %v76_v44 = vmax.f32 %v69_v39, %v74_v41 }
  0x1d   :  { %v77_v45 = vmin.f32 %v71_v42, %v76_v44 }
  0x1f   :  { %v78_v46 = vadd.f32 %v77_v45, %v75_v43 }
  0x21   :  { %v79_v47 = vmul.f32 0.5, %v78_v46 }
  0x23   :  { %80 = vst [vmem:[#allocation5] sm:$0xff] %v79_v47 }
  0x24   :  { %91 = dma.vmem_to_hbm [thread:$0]  %s87_s13, 128, %s89_s16, [#allocation4]  }
  0x25   :  { %152 = dma.done.wait [#allocation4], 128  }
  0x26   :  { %153 = vsyncadd [#allocation4], 4294967168 }
  0x27   :  { %96 = vsyncpa [#allocation3], 1 }
  0x28   :  { %97 = vsyncpa [#allocation4], 1 }

</bundles_post_ra>
